<compile_context>
chip_gen: v6e
topology: v6e:2x2x1
jax: 0.10.0
libtpu: 0.0.40
codegen_flags: <defaults>
</compile_context>

<pallas_src>
import jax
import jax.numpy as jnp
from jax.experimental import pallas as pl
from jax.experimental.pallas import tpu as pltpu

IMAGENET_MEAN = [0.485, 0.456, 0.406]
IMAGENET_STD = [0.229, 0.224, 0.225]


def get_imagenet_params(resol):
    # Mirrors the torch version: mean/std each of shape (1, 3, resol, resol).
    mean = jnp.stack(
        [jnp.full((resol, resol), IMAGENET_MEAN[i], dtype=jnp.float32) for i in range(3)]
    )[None, ...]
    std = jnp.stack(
        [jnp.full((resol, resol), IMAGENET_STD[i], dtype=jnp.float32) for i in range(3)]
    )[None, ...]
    return mean, std


def _normalize_kernel(x_ref, scale_ref, bias_ref, o_ref):
    # x block: (1, C, T); scale/bias blocks: (1, C, 1) broadcast along lanes.
    # (x - mean) / std  ==  x * (1/std) + (-mean/std)
    o_ref[...] = x_ref[...] * scale_ref[...] + bias_ref[...]


def _spatial_tile(hw, c, itemsize, target_bytes=1 << 20):
    """Pick a lane-dense spatial tile: whole H*W plane if it fits ~1 MiB,
    otherwise the largest multiple-of-128 divisor of H*W under budget."""
    if c * hw * itemsize <= target_bytes:
        return hw
    max_elems = max(128, target_bytes // (c * itemsize))
    best = None
    t = 128
    while t <= hw:
        if hw % t == 0 and t <= max_elems:
            best = t
        t += 128
    return best if best is not None else hw


def imagenet_normalize(x, scale, bias):
    """x: (N, C, H, W); scale/bias: (1, C, 1). Returns x * scale + bias."""
    N, C, H, W = x.shape
    HW = H * W
    itemsize = jnp.dtype(x.dtype).itemsize
    xf = x.reshape(N, C, HW)

    T = _spatial_tile(HW, C, itemsize)
    grid = (N, HW // T)

    x_spec = pl.BlockSpec((1, C, T), lambda n, s: (n, 0, s))
    param_spec = pl.BlockSpec((1, C, 1), lambda n, s: (0, 0, 0))

    out = pl.pallas_call(
        _normalize_kernel,
        out_shape=jax.ShapeDtypeStruct((N, C, HW), x.dtype),
        grid=grid,
        in_specs=[x_spec, param_spec, param_spec],
        out_specs=x_spec,
        compiler_params=pltpu.CompilerParams(
            dimension_semantics=("parallel", "parallel")
        ),
        cost_estimate=pl.CostEstimate(
            flops=2 * N * C * HW,
            transcendentals=0,
            bytes_accessed=2 * N * C * HW * itemsize,
        ),
    )(xf, scale, bias)
    return out.reshape(N, C, H, W)


class ImageNetNormalize:
    def __init__(self, resol):
        # Keep full-plane mean/std around (same as the PyTorch module state).
        self.mean, self.std = get_imagenet_params(resol)
        # Per-channel affine constants used by the kernel.
        mean_c = jnp.asarray(IMAGENET_MEAN, dtype=jnp.float32).reshape(1, 3, 1)
        std_c = jnp.asarray(IMAGENET_STD, dtype=jnp.float32).reshape(1, 3, 1)
        self.scale = 1.0 / std_c
        self.bias = -mean_c / std_c

    def __call__(self, x):
        return imagenet_normalize(x, self.scale, self.bias)


if __name__ == "__main__":
    resol = 16
    batch = 2
    key = jax.random.PRNGKey(0)
    # Input image with pixels in [0, 1], NCHW layout, 3 channels.
    x = jax.random.uniform(key, (batch, 3, resol, resol), dtype=jnp.float32)

    model = ImageNetNormalize(resol)
    out = model(x)
    out = jax.block_until_ready(out)

    # Reference check in plain JAX (original formulation: (x - mean) / std).
    ref = (x - model.mean) / model.std
    assert out.shape == x.shape
    assert jnp.allclose(out, ref, atol=1e-6, rtol=1e-5)
    print("KERNEL_OK")
</pallas_src>

<mosaic_0001>
module attributes {stable_mosaic.version = 11 : i64} {
  func.func @_normalize_kernel(%arg0: i32, %arg1: i32, %arg2: memref<1x3x256xf32, #tpu.memory_space<vmem>>, %arg3: memref<1x3x1xf32, #tpu.memory_space<vmem>>, %arg4: memref<1x3x1xf32, #tpu.memory_space<vmem>>, %arg5: memref<1x3x256xf32, #tpu.memory_space<vmem>>) attributes {dimension_semantics = [#tpu.dimension_semantics<parallel>, #tpu.dimension_semantics<parallel>], iteration_bounds = array<i64: 2, 1>, scalar_prefetch = 0 : i64, scratch_operands = 0 : i64, tpu.core_type = #tpu.core_type<tc>, window_params = [{transform_indices = @transform_0, window_bounds = array<i64: 1, 3, 256>}, {pipeline_mode = #tpu.pipeline_mode<synchronous>, transform_indices = @transform_1, window_bounds = array<i64: 1, 3, 1>}, {pipeline_mode = #tpu.pipeline_mode<synchronous>, transform_indices = @transform_2, window_bounds = array<i64: 1, 3, 1>}, {transform_indices = @transform_3, window_bounds = array<i64: 1, 3, 256>}]} {
    %c0 = arith.constant 0 : index
    %c0_0 = arith.constant 0 : index
    %c0_1 = arith.constant 0 : index
    %0 = vector.load %arg2[%c0, %c0_0, %c0_1] : memref<1x3x256xf32, #tpu.memory_space<vmem>>, vector<1x3x256xf32>
    %c0_2 = arith.constant 0 : index
    %c0_3 = arith.constant 0 : index
    %c0_4 = arith.constant 0 : index
    %1 = vector.load %arg3[%c0_2, %c0_3, %c0_4] : memref<1x3x1xf32, #tpu.memory_space<vmem>>, vector<1x3x1xf32>
    %2 = vector.broadcast %1 : vector<1x3x1xf32> to vector<1x3x256xf32>
    %3 = arith.mulf %0, %2 : vector<1x3x256xf32>
    %c0_5 = arith.constant 0 : index
    %c0_6 = arith.constant 0 : index
    %c0_7 = arith.constant 0 : index
    %4 = vector.load %arg4[%c0_5, %c0_6, %c0_7] : memref<1x3x1xf32, #tpu.memory_space<vmem>>, vector<1x3x1xf32>
    %5 = vector.broadcast %4 : vector<1x3x1xf32> to vector<1x3x256xf32>
    %6 = arith.addf %3, %5 : vector<1x3x256xf32>
    %c0_8 = arith.constant 0 : index
    %c0_9 = arith.constant 0 : index
    %c0_10 = arith.constant 0 : index
    %7 = vector.load %arg5[%c0_8, %c0_9, %c0_10] : memref<1x3x256xf32, #tpu.memory_space<vmem>>, vector<1x3x256xf32>
    tpu.vector_store %arg5[%c0_8, %c0_9, %c0_10], %6 {strides = array<i32>} : memref<1x3x256xf32, #tpu.memory_space<vmem>>, vector<1x3x256xf32>,
    return
  }
  func.func @transform_0(%arg0: i32, %arg1: i32) -> (i32, i32, i32) {
    %c0_i32 = arith.constant 0 : i32
    %c0_i32_0 = arith.constant 0 : i32
    return %arg0, %c0_i32, %arg1 : i32, i32, i32
  }
  func.func @transform_1(%arg0: i32, %arg1: i32) -> (i32, i32, i32) {
    %c0_i32 = arith.constant 0 : i32
    %c0_i32_0 = arith.constant 0 : i32
    %c0_i32_1 = arith.constant 0 : i32
    %c0_i32_2 = arith.constant 0 : i32
    return %c0_i32, %c0_i32_0, %c0_i32_1 : i32, i32, i32
  }
  func.func @transform_2(%arg0: i32, %arg1: i32) -> (i32, i32, i32) {
    %c0_i32 = arith.constant 0 : i32
    %c0_i32_0 = arith.constant 0 : i32
    %c0_i32_1 = arith.constant 0 : i32
    %c0_i32_2 = arith.constant 0 : i32
    return %c0_i32, %c0_i32_0, %c0_i32_1 : i32, i32, i32
  }
  func.func @transform_3(%arg0: i32, %arg1: i32) -> (i32, i32, i32) {
    %c0_i32 = arith.constant 0 : i32
    %c0_i32_0 = arith.constant 0 : i32
    return %arg0, %c0_i32, %arg1 : i32, i32, i32
  }
}

</mosaic_0001>

<bundles_post_ra>
// kernel: tpu_custom_call.1
= control target key start
LH: loop header
LB: loop body
LE: loop exit
PB: predicated region body
PF: predicated region fallthrough
CT: control target
= control target key end

     0   :  { %s413_s12 = smov 0   ;;  %s415_s13 = smov 0   ;;  %s452_s0 = inlined_call_operand.vmem [shape: f32[2,3,256], index: 0, kind: input, shape index: {}]   ;;  %s453_s1 = inlined_call_operand.vmem [shape: f32[1,3,1], index: 1, kind: input, shape index: {}]   ;;  %s454_s2 = inlined_call_operand.vmem [shape: f32[1,3,1], index: 2, kind: input, shape index: {}]   ;;  %s455_s3 = inlined_call_operand.vmem [shape: f32[2,3,256], index: 3, kind: output, shape index: {}]  }
   0x1   :  { %s417_s14 = smov 0  }
   0x2 LB: > { %s25_s15 = sadd.s32 1, %s385_s13  ;;  %p331_p0 = scmp.ge.s32.totalorder %s389_s14, 1  ;;  %s389_s14 = sphi %s417_s14, %s13_s14   ;;  %s385_s13 = sphi %s415_s13, %s457_s13   ;;  %s381_s12 = sphi %s413_s12, %s456_s12  }
   0x3   : > { %p27_p1 = scmp.ge.s32.totalorder %s25_s15, 2  ;;  %p158_p2 = scmp.lt.s32.totalorder %s389_s14, 3 }
   0x5   : > { %s459_s15 = smov (%p27_p1, %s25_s15), 0  ;;  %p159_p3 = pnand %p331_p0, %p158_p2 }
   0x6   : > { %p191_p4 = scmp.lt.s32.totalorder (!%p159_p3), %s381_s12, 1 }
   0x7   : > { %162 = sbr.rel (%p159_p3) target bundleno = 147 (0x93), region = 32 }
   0xc   : > { %v211_v0 = vld [vmem:[%s453_s1] sm:$0x7]  ;;  %v391_v1 = vmov 0   ;;  %v392_v3 = vmov 839922192   ;;  %v219_v5 = vlaneseq  ;;  %s461_s12 = smov (!%p191_p4, %s381_s12), 1 }
   0xd   : > { %366 = vset.pattern.permute.xlu0 %v391_v1  ;;  %v225_v2 = vld [vmem:[%s454_s2] sm:$0x7]  ;;  %v217_v4 = vunpack.c.l.s4 %v392_v3  ;;  %s338_s20 = sshll.u32 %s461_s12, 3 }
   0xe   : > { %214 = vperm.xlu0 %366, %v211_v0   ;;  %v220_v7 = vshrl.u32 %v219_v5, 7  ;;  %s198_s23 = scalar_lea.vmem %s452_s0, %s338_s20  ;;  %s208_s26 = scalar_lea.vmem %s455_s3, %s338_s20 }
   0xf   : > { %v218_v6 = vunpack.c.0.s8 %v217_v4  ;;  %v210_v11 = vld [vmem:[%s198_s23] sm:$0x77] }
  0x11   : > { %v221_v8 = vsub.s32 %v218_v6, %v220_v7 }
  0x12   : > { %228 = vperm.xlu0 %366, %v225_v2  }
  0x89   : > { %v215_v9 = vpop.permute.xlu0 %214 }
  0x8a   : > { %v222_v10 = vrot.slane %v215_v9, %v221_v8 }
  0x8c   : > { %v224_v13 = vmul.f32 %v222_v10, %v210_v11 }
  0x8d   : > { %v229_v12 = vpop.permute.xlu0 %228 }
  0x8e   : > { %v236_v14 = vrot.slane %v229_v12, %v221_v8 }
  0x90   : > { %v238_v15 = vadd.f32 %v236_v14, %v224_v13 }
  0x92   : > { %239 = vst [vmem:[%s208_s26] sm:$0x77] %v238_v15 }
  0x93 PF: > { %s13_s14 = sadd.s32 1, %s389_s14   ;;  %s456_s12 = smov %s385_s13 }
  0x94   : > { %p10_p5 = scmp.ge.s32.totalorder %s13_s14, 4   ;;  %s457_s13 = smov %s459_s15 }
  0x96   :  { %12 = sbr.rel (!%p10_p5) target bundleno = 2 (0x2), region = 62 }

</bundles_post_ra>
